<compile_context>
chip_gen: v7x
topology: tpu7x:2x2x1
jax: 0.10.0
libtpu: 0.0.40
codegen_flags: <defaults>
</compile_context>

<pallas_src>
import functools

import jax
import jax.numpy as jnp
from jax.experimental import pallas as pl
from jax.experimental.pallas import tpu as pltpu


def _tpu_budgets():
    """Per-generation VMEM limit, input/temp byte budget, and bf16-math flag."""
    vmem_cap = None
    try:
        get_info = getattr(pltpu, "get_tpu_info", None)
        if get_info is not None:
            info = get_info()
            vmem_cap = int(getattr(info, "vmem_capacity_bytes", None) or 0) or None
    except Exception:
        vmem_cap = None

    kind = ""
    try:
        kind = jax.devices()[0].device_kind.lower()
    except Exception:
        kind = ""

    if vmem_cap is None:
        vmem_cap = (64 << 20) if "v7" in kind else (128 << 20)

    if vmem_cap >= (100 << 20):      # v5e / v6e class (128 MiB physical VMEM)
        vmem_limit = 96 << 20
    else:                            # v7x class (64 MiB physical VMEM)
        vmem_limit = 44 << 20
    vmem_limit = min(vmem_limit, int(vmem_cap * 0.80))

    input_budget = int(vmem_limit * 0.85)

    # bf16 VPU/EUP paths exist on v6e/v7x; keep full-f32 math on older chips.
    old_gen = any(s in kind for s in ("v2", "v3", "v4", "v5"))
    bf16_fast = not old_gen
    return vmem_limit, input_budget, bf16_fast


def _logit_adjust_ce_kernel(x_ref, m_ref, cls_ref, t_ref, out_ref, *,
                            tile_n, n_true, bf16_elementwise):
    i = pl.program_id(0)
    last = pl.num_programs(0) - 1

    x = x_ref[...]                                        # (tile_n, C), native dtype
    if bf16_elementwise and x.dtype == jnp.bfloat16:
        # keep the wide elementwise chain in bf16 (v6e/v7x VPU/EUP bf16 paths)
        xm = x + m_ref[...].astype(jnp.bfloat16)
    else:
        xm = x.astype(jnp.float32) + m_ref[...]           # f32 path (v5e / f32 inputs)

    # numerically-stable log-sum-exp over classes (lane axis); accumulate in f32
    row_max = jnp.max(xm, axis=-1, keepdims=True)                          # (tile_n, 1)
    p = jnp.exp(xm - row_max)
    lse = jnp.log(jnp.sum(p.astype(jnp.float32), axis=-1, keepdims=True))  # (tile_n, 1)

    # NaN-safe target-logit gather via select against the resident class-id row
    t = t_ref[...]                                                         # (tile_n, 1) int32
    sel = jnp.where(cls_ref[...] == t, xm, 0)                              # (tile_n, C)
    tgt = jnp.sum(sel.astype(jnp.float32), axis=-1, keepdims=True)         # (tile_n, 1)

    per_sample = row_max.astype(jnp.float32) + lse - tgt                   # -log p[target]

    @pl.when(i != last)
    def _store_full():
        s = jnp.sum(per_sample, axis=0, keepdims=True)                     # (1, 1)
        out_ref[...] = jnp.broadcast_to(s, out_ref.shape)

    @pl.when(i == last)                                                    # only tile with padding
    def _store_masked():
        row_ids = i * tile_n + jax.lax.broadcasted_iota(jnp.int32, per_sample.shape, 0)
        contrib = jnp.where(row_ids < n_true, per_sample, 0.0)
        s = jnp.sum(contrib, axis=0, keepdims=True)
        out_ref[...] = jnp.broadcast_to(s, out_ref.shape)


def logit_adjust_loss(x, target, cls_num_list, tau=1.0, tile_n=None):
    """Equivalent of LogitAdjust(cls_num_list, tau).forward(x, target)."""
    # TODO(synk): per-class `weight` of F.cross_entropy not implemented (module default is None).
    x = jnp.asarray(x)                       # keep native dtype (bf16 welcome)
    target = jnp.asarray(target).astype(jnp.int32)
    N, C = x.shape
    itemsize = jnp.dtype(x.dtype).itemsize

    # m_list = tau * log(class prior) and the resident class-id row (tiny JAX glue)
    cls_num = jnp.asarray(cls_num_list, jnp.float32)
    m_list = (tau * jnp.log(cls_num / jnp.sum(cls_num))).reshape(1, C)
    cls_row = jnp.arange(C, dtype=jnp.int32).reshape(1, C)

    vmem_limit, input_budget, bf16_fast = _tpu_budgets()
    bf16_elementwise = bool(bf16_fast and x.dtype == jnp.bfloat16)

    # --- tile-size selection: by bytes, may grow ------------------------------
    c_lanes = ((C + 127) // 128) * 128        # VMEM lane padding of the class axis

    def vmem_tile_bytes(t):
        logits = 2 * t * c_lanes * itemsize   # double-buffered logits tiles
        targets = 2 * t * 128 * 4             # (t, 1) int32 block pads to 128 lanes
        temps = 3 * t * c_lanes * 4           # f32 xm/exp/select temporaries headroom
        return logits + targets + temps

    n_up8 = ((N + 7) // 8) * 8
    if tile_n is None:
        tile_n = (4 << 20) // max(1, C * itemsize)     # ~4 MiB of logits per DMA tile
    tile_n = max(8, (int(tile_n) // 8) * 8)
    tile_n = min(tile_n, n_up8)
    while tile_n > 8 and vmem_tile_bytes(tile_n) > input_budget:
        tile_n //= 2
    tile_n = max(8, (tile_n // 8) * 8)

    num_tiles = pl.cdiv(N, tile_n)
    n_pad = num_tiles * tile_n
    if n_pad != N:
        x = jnp.pad(x, ((0, n_pad - N), (0, 0)))
        target = jnp.pad(target, (0, n_pad - N))
    t2d = target.reshape(n_pad, 1)

    kernel = functools.partial(_logit_adjust_ce_kernel, tile_n=tile_n, n_true=N,
                               bf16_elementwise=bf16_elementwise)

    partials = pl.pallas_call(
        kernel,
        out_shape=jax.ShapeDtypeStruct((1, num_tiles * 128), jnp.float32),
        grid=(num_tiles,),
        in_specs=[
            pl.BlockSpec((tile_n, C), lambda i: (i, 0)),   # logits tile (pipelined)
            pl.BlockSpec((1, C), lambda i: (0, 0)),        # m_list (resident)
            pl.BlockSpec((1, C), lambda i: (0, 0)),        # class ids (resident)
            pl.BlockSpec((tile_n, 1), lambda i: (i, 0)),   # targets tile (pipelined)
        ],
        out_specs=pl.BlockSpec((1, 128), lambda i: (0, i)),  # per-tile partial sum
        compiler_params=pltpu.CompilerParams(
            dimension_semantics=("parallel",),               # both TensorCores on v7x
            vmem_limit_bytes=vmem_limit,
        ),
    )(x, m_list, cls_row, t2d)

    tile_sums = partials.reshape(num_tiles, 128)[:, 0]
    return jnp.sum(tile_sums) / jnp.float32(N)               # mean reduction


def _reference_loss(x, target, cls_num_list, tau=1.0):
    cls_num = jnp.asarray(cls_num_list, jnp.float32)
    m = tau * jnp.log(cls_num / jnp.sum(cls_num))
    xm = jnp.asarray(x, jnp.float32) + m[None, :]
    logp = jax.nn.log_softmax(xm, axis=-1)
    return -jnp.mean(logp[jnp.arange(x.shape[0]), target])


if __name__ == "__main__":
    key = jax.random.PRNGKey(0)
    k1, k2, k3 = jax.random.split(key, 3)

    C = 32
    # deterministic synthetic imbalanced class counts
    cls_num_list = jnp.arange(1, C + 1, dtype=jnp.float32) * 10.0

    # case 1: f32 logits, forced tiny tile -> 3 parallel grid steps + per-tile partials
    N1 = 24
    x1 = jax.random.normal(k1, (N1, C), dtype=jnp.float32)
    t1 = jax.random.randint(k2, (N1,), 0, C, dtype=jnp.int32)
    loss1 = logit_adjust_loss(x1, t1, cls_num_list, tau=1.0, tile_n=8)
    jax.block_until_ready(loss1)
    ref1 = _reference_loss(x1, t1, cls_num_list, tau=1.0)
    assert jnp.allclose(loss1, ref1, rtol=1e-5, atol=1e-5), (loss1, ref1)

    # case 2: auto tile sizing + batch not a multiple of 8 (exercises last-tile masking)
    N2 = 13
    x2 = jax.random.normal(k3, (N2, C), dtype=jnp.float32)
    t2 = jax.random.randint(k2, (N2,), 0, C, dtype=jnp.int32)
    loss2 = logit_adjust_loss(x2, t2, cls_num_list, tau=1.0)
    jax.block_until_ready(loss2)
    ref2 = _reference_loss(x2, t2, cls_num_list, tau=1.0)
    assert jnp.allclose(loss2, ref2, rtol=1e-5, atol=1e-5), (loss2, ref2)

    # case 3: bf16 logits (bf16 elementwise math on v6e/v7x, f32 on older chips)
    x3 = x1.astype(jnp.bfloat16)
    loss3 = logit_adjust_loss(x3, t1, cls_num_list, tau=1.0, tile_n=8)
    jax.block_until_ready(loss3)
    ref3 = _reference_loss(x3.astype(jnp.float32), t1, cls_num_list, tau=1.0)
    assert jnp.allclose(loss3, ref3, rtol=3e-2, atol=3e-2), (loss3, ref3)

    print("KERNEL_OK")
</pallas_src>

<mosaic_0001>
module attributes {stable_mosaic.version = 11 : i64} {
  func.func @_logit_adjust_ce_kernel(%arg0: i32, %arg1: memref<8x32xf32, #tpu.memory_space<vmem>>, %arg2: memref<1x32xf32, #tpu.memory_space<vmem>>, %arg3: memref<1x32xi32, #tpu.memory_space<vmem>>, %arg4: memref<8x1xi32, #tpu.memory_space<vmem>>, %arg5: memref<1x128xf32, #tpu.memory_space<vmem>>) attributes {dimension_semantics = [#tpu.dimension_semantics<parallel>], iteration_bounds = array<i64: 3>, scalar_prefetch = 0 : i64, scratch_operands = 0 : i64, tpu.core_type = #tpu.core_type<tc>, window_params = [{transform_indices = @transform_0, window_bounds = array<i64: 8, 32>}, {pipeline_mode = #tpu.pipeline_mode<synchronous>, transform_indices = @transform_1, window_bounds = array<i64: 1, 32>}, {pipeline_mode = #tpu.pipeline_mode<synchronous>, transform_indices = @transform_2, window_bounds = array<i64: 1, 32>}, {transform_indices = @transform_3, window_bounds = array<i64: 8, 1>}, {transform_indices = @transform_4, window_bounds = array<i64: 1, 128>}]} {
    %c0 = arith.constant 0 : index
    %c0_0 = arith.constant 0 : index
    %0 = vector.load %arg1[%c0, %c0_0] : memref<8x32xf32, #tpu.memory_space<vmem>>, vector<8x32xf32>
    %c0_1 = arith.constant 0 : index
    %c0_2 = arith.constant 0 : index
    %1 = vector.load %arg2[%c0_1, %c0_2] : memref<1x32xf32, #tpu.memory_space<vmem>>, vector<1x32xf32>
    %2 = vector.broadcast %1 : vector<1x32xf32> to vector<8x32xf32>
    %3 = arith.addf %0, %2 : vector<8x32xf32>
    %cst = arith.constant dense<0xFF800000> : vector<8xf32>
    %4 = vector.multi_reduction <maximumf>, %3, %cst [1] : vector<8x32xf32> to vector<8xf32>
    %5 = vector.shape_cast %4 : vector<8xf32> to vector<8x1xf32>
    %6 = vector.broadcast %5 : vector<8x1xf32> to vector<8x32xf32>
    %7 = arith.subf %3, %6 : vector<8x32xf32>
    %8 = math.exp %7 : vector<8x32xf32>
    %cst_3 = arith.constant dense<0.000000e+00> : vector<8xf32>
    %9 = vector.multi_reduction <add>, %8, %cst_3 [1] : vector<8x32xf32> to vector<8xf32>
    %10 = vector.shape_cast %9 : vector<8xf32> to vector<8x1xf32>
    %11 = math.log %10 : vector<8x1xf32>
    %c0_4 = arith.constant 0 : index
    %c0_5 = arith.constant 0 : index
    %12 = vector.load %arg4[%c0_4, %c0_5] : memref<8x1xi32, #tpu.memory_space<vmem>>, vector<8x1xi32>
    %c0_6 = arith.constant 0 : index
    %c0_7 = arith.constant 0 : index
    %13 = vector.load %arg3[%c0_6, %c0_7] : memref<1x32xi32, #tpu.memory_space<vmem>>, vector<1x32xi32>
    %14 = vector.broadcast %13 : vector<1x32xi32> to vector<8x32xi32>
    %15 = vector.broadcast %12 : vector<8x1xi32> to vector<8x32xi32>
    %16 = arith.cmpi eq, %14, %15 : vector<8x32xi32>
    %c0_i32 = arith.constant 0 : i32
    %17 = arith.sitofp %c0_i32 : i32 to f32
    %18 = vector.broadcast %17 : f32 to vector<8x32xf32>
    %19 = arith.select %16, %3, %18 : vector<8x32xi1>, vector<8x32xf32>
    %cst_8 = arith.constant dense<0.000000e+00> : vector<8xf32>
    %20 = vector.multi_reduction <add>, %19, %cst_8 [1] : vector<8x32xf32> to vector<8xf32>
    %21 = vector.shape_cast %20 : vector<8xf32> to vector<8x1xf32>
    %22 = arith.addf %5, %11 : vector<8x1xf32>
    %23 = arith.subf %22, %21 : vector<8x1xf32>
    %c2_i32 = arith.constant 2 : i32
    %24 = arith.cmpi ne, %arg0, %c2_i32 : i32
    %25 = arith.extui %24 : i1 to i32
    %c0_i32_9 = arith.constant 0 : i32
    %26 = arith.cmpi ne, %25, %c0_i32_9 : i32
    scf.if %26 {
      %cst_12 = arith.constant dense<0.000000e+00> : vector<1xf32>
      %30 = vector.multi_reduction <add>, %23, %cst_12 [0] : vector<8x1xf32> to vector<1xf32>
      %31 = vector.shape_cast %30 : vector<1xf32> to vector<1x1xf32>
      %32 = vector.shape_cast %31 : vector<1x1xf32> to vector<1x1xf32>
      %33 = vector.broadcast %32 : vector<1x1xf32> to vector<1x128xf32>
      %c0_13 = arith.constant 0 : index
      %c0_14 = arith.constant 0 : index
      %34 = vector.load %arg5[%c0_13, %c0_14] : memref<1x128xf32, #tpu.memory_space<vmem>>, vector<1x128xf32>
      tpu.vector_store %arg5[%c0_13, %c0_14], %33 {strides = array<i32>} : memref<1x128xf32, #tpu.memory_space<vmem>>, vector<1x128xf32>,
    } else {
    }
    %c2_i32_10 = arith.constant 2 : i32
    %27 = arith.cmpi eq, %arg0, %c2_i32_10 : i32
    %28 = arith.extui %27 : i1 to i32
    %c0_i32_11 = arith.constant 0 : i32
    %29 = arith.cmpi ne, %28, %c0_i32_11 : i32
    scf.if %29 {
      %c8_i32 = arith.constant 8 : i32
      %30 = arith.muli %arg0, %c8_i32 : i32
      %31 = tpu.iota {dimensions = array<i32: 0>} : vector<8x1xi32>
      %32 = vector.broadcast %30 : i32 to vector<8x1xi32>
      %33 = arith.addi %32, %31 : vector<8x1xi32>
      %c24_i32 = arith.constant 24 : i32
      %34 = vector.broadcast %c24_i32 : i32 to vector<8x1xi32>
      %35 = arith.cmpi slt, %33, %34 : vector<8x1xi32>
      %cst_12 = arith.constant 0.000000e+00 : f32
      %36 = vector.broadcast %cst_12 : f32 to vector<8x1xf32>
      %37 = arith.select %35, %23, %36 : vector<8x1xi1>, vector<8x1xf32>
      %cst_13 = arith.constant dense<0.000000e+00> : vector<1xf32>
      %38 = vector.multi_reduction <add>, %37, %cst_13 [0] : vector<8x1xf32> to vector<1xf32>
      %39 = vector.shape_cast %38 : vector<1xf32> to vector<1x1xf32>
      %40 = vector.shape_cast %39 : vector<1x1xf32> to vector<1x1xf32>
      %41 = vector.broadcast %40 : vector<1x1xf32> to vector<1x128xf32>
      %c0_14 = arith.constant 0 : index
      %c0_15 = arith.constant 0 : index
      %42 = vector.load %arg5[%c0_14, %c0_15] : memref<1x128xf32, #tpu.memory_space<vmem>>, vector<1x128xf32>
      tpu.vector_store %arg5[%c0_14, %c0_15], %41 {strides = array<i32>} : memref<1x128xf32, #tpu.memory_space<vmem>>, vector<1x128xf32>,
    } else {
    }
    return
  }
  func.func @transform_0(%arg0: i32) -> (i32, i32) {
    %c0_i32 = arith.constant 0 : i32
    %c0_i32_0 = arith.constant 0 : i32
    return %arg0, %c0_i32 : i32, i32
  }
  func.func @transform_1(%arg0: i32) -> (i32, i32) {
    %c0_i32 = arith.constant 0 : i32
    %c0_i32_0 = arith.constant 0 : i32
    %c0_i32_1 = arith.constant 0 : i32
    return %c0_i32, %c0_i32_0 : i32, i32
  }
  func.func @transform_2(%arg0: i32) -> (i32, i32) {
    %c0_i32 = arith.constant 0 : i32
    %c0_i32_0 = arith.constant 0 : i32
    %c0_i32_1 = arith.constant 0 : i32
    return %c0_i32, %c0_i32_0 : i32, i32
  }
  func.func @transform_3(%arg0: i32) -> (i32, i32) {
    %c0_i32 = arith.constant 0 : i32
    %c0_i32_0 = arith.constant 0 : i32
    return %arg0, %c0_i32 : i32, i32
  }
  func.func @transform_4(%arg0: i32) -> (i32, i32) {
    %c0_i32 = arith.constant 0 : i32
    %c0_i32_0 = arith.constant 0 : i32
    return %c0_i32, %arg0 : i32, i32
  }
}

</mosaic_0001>

<bundles_post_ra>
// kernel: tpu_custom_call.1
= control target key start
LH: loop header
LB: loop body
LE: loop exit
PB: predicated region body
PF: predicated region fallthrough
CT: control target
= control target key end

     0   :  { %s1053_s0 = inlined_call_operand.hbm [shape: f32[24,32], index: 0, kind: input, shape index: {}]   ;;  %s1054_s1 = inlined_call_operand.hbm [shape: f32[1,32], index: 1, kind: input, shape index: {}]   ;;  %s1055_s2 = inlined_call_operand.hbm [shape: s32[1,32], index: 2, kind: input, shape index: {}]   ;;  %s1056_s3 = inlined_call_operand.hbm [shape: s32[24,1], index: 3, kind: input, shape index: {}]   ;;  %s1057_s4 = inlined_call_operand.hbm [shape: f32[1,384], index: 4, kind: output, shape index: {}]  }
   0x1   :  { %1063 = sst [smem:[#allocation15_spill]] %s1053_s0 }
   0x2   :  { %9 = vsyncpa [#allocation3], 0 }
   0x3   :  { %11 = vsyncpa [#allocation3 + $0x1], 0 }
   0x4   :  { %12 = vsyncpa [#allocation6], 0 }
   0x5   :  { %13 = vsyncpa [#allocation9], 0 }
   0x6   :  { %15 = vsyncpa [#allocation9 + $0x1], 0 }
   0x7   :  { %16 = vsyncpa [#allocation4], 0 }
   0x8   :  { %18 = vsyncpa [#allocation4 + $0x1], 0  ;;  %s784_s15 = smov 0   ;;  %s786_s16 = smov 0  }
   0x9   :  { %s788_s17 = smov 0   ;;  %s790_s18 = smov 0  }
   0xa LB: > { %s805_s19 = sadd.s32 4294967295, %s751_s18   ;;  %s461_s20 = sadd.s32 4294967294, %s751_s18   ;;  %s751_s18 = sphi %s790_s18, %s1083_s18   ;;  %s747_s17 = sphi %s788_s17, %s1082_s17   ;;  %s743_s16 = sphi %s786_s16, %s1081_s16   ;;  %s739_s15 = sphi %s784_s15, %s1080_s15  }
   0xb   : > { %p44_p0 = scmp.ne.s32.totalorder %s743_s16, %s739_s15  ;;  %p1058_p1 = scmp.eq.s32.totalorder %s805_s19, 0 }
   0xc   : > { %p142_p3 = scmp.eq.s32.totalorder %s461_s20, 2  ;;  %p462_p5 = scmp.ge.s32.totalorder %s751_s18, 1 }
   0xd   : > { %p814_p4 = por %p1058_p1, %p44_p0  ;;  %p149_p7 = scmp.lt.s32.totalorder %s751_s18, 4 }
   0xe   : > { %p819_p6 = por %p142_p3, %p44_p0  ;;  %s753_s24 = smov [#allocation5]  }
   0xf   : > { %s1064_s21 = scalar_select %p814_p4, 1, 0 }
  0x10   : > { %s1065_s22 = scalar_select %p819_p6, 1, 0 }
  0x11   : > { %p824_p8 = pnand %p462_p5, %p149_p7  ;;  %s162_s25 = sshll.u32 %s753_s24, 4  ;;  %s163_s25 = int_to_ptr.vmem [resolvable:$true] %s162_s25 }
  0x12   : > { %s754_s26 = smov [#allocation7]   ;;  %s839_s29 = sadd.s32 1, %s751_s18  }
  0x13   : > { %s1066_s23 = scalar_select %p824_p8, 1, 0 }
  0x14   : > { %p497_p9 = pneg %p824_p8  ;;  %s173_s27 = sshll.u32 %s754_s26, 4  ;;  %s836_s27 = int_to_ptr.vmem [resolvable:$true] %s173_s27 }
  0x15   : > { %s28_s30 = ssub.s32 %s751_s18, %s839_s29  ;;  %s561_s7 = scalar_lea.hbm %s1054_s1, 16 }
  0x16   : > { %p832_p10 = pnand %p497_p9, %p1058_p1  ;;  %p562_p11 = scmp.ne.s32.totalorder %s1054_s1, %s561_s7 }
  0x17   : > { %p568_p3 = scmp.lt.u32.totalorder %s561_s7, %s1054_s1 }
  0x18   : > { %p563_p12 = pneg %p832_p10 }
  0x1a   : > { %p564_p13 = pnand %p563_p12, %p562_p11 }
  0x1c   : > { %p565_p0 = pneg %p564_p13 }
  0x1e   : > { %p570_p5 = pnand %p568_p3, %p565_p0 }
  0x20   : > { %573 = shalt.err (!%p570_p5)
}
  0x21   : > { %s574_s12 = scalar_lea.vmem %s163_s25, 16  ;;  %s581_s13 = scalar_lea.vmem %s163_s25, 32 }
  0x22   : > { %p575_p7 = scmp.ne.s32.totalorder %s163_s25, %s574_s12  ;;  %p582_p2 = scmp.lt.s32.totalorder %s163_s25, %s163_s25 }
  0x23   : > { %p583_p6 = scmp.lt.s32.totalorder %s581_s13, %s574_s12 }
  0x24   : > { %p577_p9 = pnand %p575_p7, %p563_p12 }
  0x25   : > { %p584_p4 = por %p583_p6, %p582_p2 }
  0x26   : > { %p578_p1 = pneg %p577_p9 }
  0x28   : > { %p585_p8 = pnand %p584_p4, %p578_p1 }
  0x2a   : > { %588 = shalt.err (!%p585_p8)
}
  0x2b   : > { %500 = dma.hbm_to_vmem [thread:$0]  (!%p832_p10), %s1054_s1, 16, %s163_s25, [#allocation6]  }
  0x2c   : > { %s589_s5 = scalar_lea.hbm %s1055_s2, 16 }
  0x2d   : > { %p590_p11 = scmp.ne.s32.totalorder %s1055_s2, %s589_s5  ;;  %p596_p4 = scmp.lt.u32.totalorder %s589_s5, %s1055_s2 }
  0x2f   : > { %p592_p2 = pnand %p590_p11, %p563_p12 }
  0x31   : > { %p593_p1 = pneg %p592_p2 }
  0x33   : > { %p598_p6 = pnand %p596_p4, %p593_p1 }
  0x35   : > { %601 = shalt.err (!%p598_p6)
}
  0x36   : > { %s602_s25 = scalar_lea.vmem %s836_s27, 16  ;;  %s609_s10 = scalar_lea.vmem %s836_s27, 32 }
  0x37   : > { %p603_p8 = scmp.ne.s32.totalorder %s836_s27, %s602_s25  ;;  %p610_p3 = scmp.lt.s32.totalorder %s836_s27, %s836_s27 }
  0x38   : > { %p611_p5 = scmp.lt.s32.totalorder %s609_s10, %s602_s25 }
  0x39   : > { %p605_p13 = pnand %p603_p8, %p563_p12 }
  0x3a   : > { %p612_p7 = por %p611_p5, %p610_p3 }
  0x3b   : > { %p606_p0 = pneg %p605_p13 }
  0x3d   : > { %p613_p9 = pnand %p612_p7, %p606_p0 }
  0x3f   : > { %616 = shalt.err (!%p613_p9)
}
  0x40   : > { %503 = dma.hbm_to_vmem [thread:$0]  (!%p832_p10), %s1055_s2, 16, %s836_s27, [#allocation6]  }
  0x41   : > { %p29_p12 = scmp.eq.s32.totalorder %s28_s30, 0  ;;  %s31_s13 = sadd.s32 1, %s747_s17 }
  0x42   : > { %p38_p11 = scmp.ne.s32.totalorder %s747_s17, %s743_s16  ;;  %p39_p2 = scmp.eq.s32.totalorder %s751_s18, 0 }
  0x43   : > { %s899_s28 = scalar_select %p29_p12, %s747_s17, %s31_s13  }
  0x44   : > { %p40_p1 = por %p39_p2, %p38_p11  ;;  %p1068_p4 = scmp.eq.s32.totalorder %s805_s19, 2 }
  0x45   : > { %p517_p8 = scmp.lt.s32.totalorder %s751_s18, 3  ;;  %s909_s20 = sand.u32 1, %s747_s17  }
  0x46   : > { %p903_p6 = por %p1068_p4, %p38_p11  ;;  %s1061_s27 = sshll.u32 %s909_s20, 3 }
  0x47   : > { %s467_s24 = sshll.u32 %s751_s18, 7  ;;  %s1070_s0 = sld [smem:[#allocation15_spill]] }
  0x48   : > { %s1069_s14 = scalar_select %p903_p6, 1, 0 }
  0x49   : > { %s188_s6 = scalar_lea.vmem [#allocation2], %s1061_s27  ;;  %p922_p10 = pnand %p517_p8, %p40_p1 }
  0x4a   : > { %s195_s7 = sshll.u32 %s188_s6, 4  ;;  %s929_s10 = scalar_lea.hbm %s1056_s3, %s467_s24  ;;  %s920_s7 = int_to_ptr.vmem [resolvable:$true] %s195_s7 }
  0x4b   : > { %s185_s11 = scalar_lea.sflag [#allocation3], %s909_s20  ;;  %p619_p0 = pneg %p922_p10 }
  0x4d   : > { %s916_s5 = scalar_lea.hbm %s1070_s0, %s467_s24  ;;  %s622_s26 = scalar_lea.hbm %s1070_s0, 384 }
  0x4e   : > { %s617_s12 = scalar_lea.hbm %s916_s5, 128  ;;  %p623_p7 = scmp.lt.u32.totalorder %s916_s5, %s1070_s0 }
  0x4f   : > { %p618_p13 = scmp.ne.s32.totalorder %s916_s5, %s617_s12  ;;  %p624_p9 = scmp.lt.u32.totalorder %s622_s26, %s617_s12 }
  0x50   : > { %p626_p11 = scmp.lt.u32.totalorder %s617_s12, %s916_s5 }
  0x51   : > { %p620_p3 = pnand %p619_p0, %p618_p13  ;;  %p625_p12 = por %p624_p9, %p623_p7 }
  0x53   : > { %p621_p5 = pneg %p620_p3  ;;  %p627_p2 = por %p626_p11, %p625_p12 }
  0x55   : > { %p628_p1 = pnand %p627_p2, %p621_p5 }
  0x57   : > { %631 = shalt.err (!%p628_p1)
}
  0x58   : > { %s632_s24 = scalar_lea.vmem %s920_s7, 128  ;;  %s755_s9 = smov [#allocation2]  }
  0x59   : > { %p633_p4 = scmp.ne.s32.totalorder %s920_s7, %s632_s24  ;;  %s637_s25 = sshll.u32 %s755_s9, 4  ;;  %s638_s25 = int_to_ptr.vmem [resolvable:$false] %s637_s25 }
  0x5a   : > { %s639_s27 = scalar_lea.vmem %s638_s25, 256  ;;  %p640_p3 = scmp.lt.s32.totalorder %s920_s7, %s638_s25 }
  0x5b   : > { %p635_p8 = pnand %p633_p4, %p619_p0  ;;  %p641_p7 = scmp.lt.s32.totalorder %s639_s27, %s632_s24 }
  0x5d   : > { %p636_p13 = pneg %p635_p8  ;;  %p642_p9 = por %p641_p7, %p640_p3 }
  0x5f   : > { %p643_p12 = pnand %p642_p9, %p636_p13 }
  0x61   : > { %646 = shalt.err (!%p643_p12)
}
  0x62   : > { %507 = dma.hbm_to_vmem [thread:$0]  (!%p922_p10), %s916_s5, 128, %s920_s7, %s185_s11  }
  0x63   : > { %s1072_s12 = sshll.u32 %s909_s20, 3  ;;  %s203_s26 = scalar_lea.sflag [#allocation9], %s909_s20 }
  0x64   : > { %s206_s13 = scalar_lea.vmem [#allocation8], %s1072_s12  ;;  %s647_s6 = scalar_lea.hbm %s929_s10, 128 }
  0x65   : > { %s213_s30 = sshll.u32 %s206_s13, 4  ;;  %p648_p5 = scmp.ne.s32.totalorder %s929_s10, %s647_s6  ;;  %s214_s30 = int_to_ptr.vmem [resolvable:$true] %s213_s30 }
  0x66   : > { %s652_s25 = scalar_lea.hbm %s1056_s3, 384  ;;  %p653_p1 = scmp.lt.u32.totalorder %s929_s10, %s1056_s3 }
  0x67   : > { %p650_p11 = pnand %p648_p5, %p619_p0  ;;  %p654_p4 = scmp.lt.u32.totalorder %s652_s25, %s647_s6 }
  0x68   : > { %p656_p13 = scmp.lt.u32.totalorder %s647_s6, %s929_s10 }
  0x69   : > { %p651_p2 = pneg %p650_p11  ;;  %p655_p8 = por %p654_p4, %p653_p1 }
  0x6b   : > { %p657_p3 = por %p656_p13, %p655_p8 }
  0x6d   : > { %p658_p7 = pnand %p657_p3, %p651_p2 }
  0x6f   : > { %661 = shalt.err (!%p658_p7)
}
  0x70   : > { %s662_s20 = scalar_lea.vmem %s214_s30, 128  ;;  %s756_s5 = smov [#allocation8]  }
  0x71   : > { %p663_p9 = scmp.ne.s32.totalorder %s214_s30, %s662_s20  ;;  %s667_s7 = sshll.u32 %s756_s5, 4  ;;  %s668_s7 = int_to_ptr.vmem [resolvable:$false] %s667_s7 }
  0x72   : > { %s669_s11 = scalar_lea.vmem %s668_s7, 256  ;;  %p670_p11 = scmp.lt.s32.totalorder %s214_s30, %s668_s7 }
  0x73   : > { %p665_p12 = pnand %p663_p9, %p619_p0  ;;  %p671_p6 = scmp.lt.s32.totalorder %s669_s11, %s662_s20 }
  0x75   : > { %p666_p5 = pneg %p665_p12  ;;  %p672_p1 = por %p671_p6, %p670_p11 }
  0x77   : > { %p673_p4 = pnand %p672_p1, %p666_p5 }
  0x79   : > { %676 = shalt.err (!%p673_p4)
}
  0x7a   : > { %510 = dma.hbm_to_vmem [thread:$0]  (!%p922_p10), %s929_s10, 128, %s214_s30, %s203_s26  }
  0x7b   : > { %p1073_p2 = scmp.ne.s32.totalorder %s1066_s23, 0 }
  0x7c   : > { %s982_s0 = sand.u32 (!%p1073_p2), 1, %s743_s16   ;;  %p1074_p0 = scmp.ne.s32.totalorder (!%p1073_p2), %s1064_s21, 0 }
  0x7d   : > { %222 = sbr.rel (%p1073_p2) target bundleno = 520 (0x208), region = 36  ;;  %s471_s12 = sshll.u32 (!%p1073_p2), %s982_s0, 3 }
  0x7e   : > { %s225_s13 = scalar_lea.sflag (!%p1073_p2), [#allocation3], %s982_s0  ;;  %s228_s6 = scalar_lea.vmem (!%p1073_p2), [#allocation2], %s471_s12 }
  0x84   : > { %722 = dma.done.wait (%p1074_p0), %s225_s13, 128  }
  0x85   : > { %724 = vsyncadd (%p1074_p0), %s225_s13, 4294967168  ;;  %p1075_p6 = scmp.eq.s32.totalorder %s805_s19, 0 }
  0x87   : > { %726 = dma.done.wait (%p1075_p6), [#allocation6], 32   ;;  %p1076_p10 = pmov %p1075_p6 }
  0x88   : > { %s242_s23 = scalar_lea.sflag [#allocation9], %s982_s0  ;;  %s245_s8 = scalar_lea.vmem [#allocation8], %s471_s12 }
  0x89   : > { %728 = vsyncadd (%p1076_p10), [#allocation6], 4294967264 }
  0x8a   : > { %730 = dma.done.wait (%p1074_p0), %s242_s23, 128  }
  0x8b   : > { %732 = vsyncadd (%p1074_p0), %s242_s23, 4294967168  ;;  %v757_v0 = vmov 0   ;;  %v274_v1 = vld [vmem:[%s228_s6] sm:$0xff]  ;;  %v475_v2 = vld [vmem:[#allocation5] ss:$0 sm:$0xff]  ;;  %vm283_vm0 = vcmask 261120  }
  0x8c   : > { %556 = vset.pattern.permute.xlu0 %v757_v0  ;;  %v282_v3 = vadd.f32 %v475_v2, %v274_v1  ;;  %v295_v5 = vld [vmem:[%s245_s8] sm:$0xff]  ;;  %v476_v9 = vld [vmem:[#allocation7] ss:$0 sm:$0xff]  ;;  %s1003_s21 = scalar_lea.vmem [#allocation10], %s982_s0  ;;  %p1077_p8 = scmp.eq.s32.totalorder %s805_s19, 2 }
  0x8e   : > { %v284_v4 = vsel %vm283_vm0, %v282_v3, -inf }
  0x8f   : > { %285 = vmax.xlane.f32.xlu0 %v284_v4 }
  0xa5   : > { %302 = vperm.xlu0 %556, %v295_v5  }
 0x11c   : > { %v286_v6 = vpop.xlane.xlu0 %285 }
 0x11d   : > { %v287_v7 = vsub.f32 %v282_v3, %v286_v6 }
 0x11f   : > { %v288_v8 = vmul.f32 1.442695, %v287_v7 }
 0x121   : > { %557 = vpow2.f32 %v288_v8 }
 0x124   : > { %v303_v10 = vpop.permute.xlu0 %302 }
 0x125   : > { %vm304_vm1 = vcmp.eq.s32.totalorder %v476_v9, %v303_v10 }
 0x126   : > { %v305_v12 = vsel %vm304_vm1, %v282_v3, 0.0 }
 0x127   : > { %v306_v14 = vsel %vm283_vm0, %v305_v12, 0.0 }
 0x12b   : > { %v558_v11 = vpop.eup %557 }
 0x12c   : > { %v290_v13 = vsel %vm283_vm0, %v558_v11, 0.0 }
 0x12d   : > { %291 = vadd.xlane.f32.xlu1 %v290_v13 }
 0x131   : > { %307 = vadd.xlane.f32.xlu1 %v306_v14 }
 0x1ba   : > { %v292_v15 = vpop.xlane.xlu1 %291 }
 0x1bb   : > { %559 = vlog2.f32 %v292_v15 }
 0x1be   : > { %v308_v18 = vpop.xlane.xlu1 %307 }
 0x1c4   : > { %314 = sbr.rel (%p1077_p8) target bundleno = 473 (0x1d9), region = 56 }
 0x1c5   : > { %v560_v16 = vpop.eup %559 }
 0x1c6   : > { %v294_v17 = vmul.f32 0.6931472, %v560_v16 }
 0x1c8   : > { %v309_v19 = vadd.f32 %v294_v17, %v286_v6 }
 0x1ca   : > { %v310_v20 = vsub.f32 %v309_v19, %v308_v18 }
 0x1cc   : > { %v315_v21 = vrot.slane %v310_v20, 4 }
 0x1ce   : > { %v316_v22 = vadd.f32 %v315_v21, %v310_v20 }
 0x1d0   : > { %v317_v23 = vrot.slane %v316_v22, 2 }
 0x1d2   : > { %v318_v24 = vadd.f32 %v317_v23, %v316_v22 }
 0x1d4   : > { %v319_v25 = vrot.slane %v318_v24, 1 }
 0x1d6   : > { %v320_v26 = vadd.f32 %v319_v25, %v318_v24 }
 0x1d8   : > { %321 = vst [vmem:[%s1003_s21] sm:$0x1] %v320_v26 }
 0x1d9 PF: > { %p478_p13 = scmp.ne.s32.totalorder %s805_s19, 2 }
 0x1da   : > { %s479_s10 = sshll.u32 (!%p478_p13), %s805_s19, 3  ;;  %v327_v27 = vlaneseq (!%p478_p13) }
 0x1db   : > { %325 = sbr.rel (%p478_p13) target bundleno = 495 (0x1ef), region = 60  ;;  %v329_v28 = vstv (!%p478_p13), %s479_s10 }
 0x1dc   : > { %v328_v29 = vshrl.u32 (!%p478_p13), %v327_v27, 7 }
 0x1de   : > { %v330_v30 = vadd.s32 (!%p478_p13), %v329_v28, %v328_v29 }
 0x1e0   : > { %vm331_vm2 = vcmp.lt.s32.totalorder (!%p478_p13), %v330_v30, 24 }
 0x1e1   : > { %v332_v31 = vsel (!%p478_p13), %vm331_vm2, %v310_v20, 0.0 }
 0x1e2   : > { %v333_v32 = vrot.slane %v332_v31, 4 }
 0x1e4   : > { %v334_v33 = vadd.f32 %v333_v32, %v332_v31 }
 0x1e6   : > { %v335_v34 = vrot.slane %v334_v33, 2 }
 0x1e8   : > { %v336_v35 = vadd.f32 %v335_v34, %v334_v33 }
 0x1ea   : > { %v337_v36 = vrot.slane %v336_v35, 1 }
 0x1ec   : > { %v338_v37 = vadd.f32 %v337_v36, %v336_v35 }
 0x1ee   : > { %339 = vst [vmem:[%s1003_s21] sm:$0x1] %v338_v37 }
 0x1ef PF: > { %s480_s30 = sshll.u32 %s805_s19, 4  ;;  %s353_s25 = sshll.u32 %s1003_s21, 4  ;;  %s354_s25 = int_to_ptr.vmem [resolvable:$true] %s353_s25 }
 0x1f0   : > { %s1015_s9 = scalar_lea.hbm %s1057_s4, %s480_s30  ;;  %s341_s27 = scalar_lea.sflag [#allocation4], %s982_s0 }
 0x1f1   : > { %s677_s20 = scalar_lea.vmem %s354_s25, 16  ;;  %p1078_p7 = scmp.ne.s32.totalorder %s1069_s14, 0 }
 0x1f2   : > { %p678_p3 = scmp.ne.s32.totalorder %s354_s25, %s677_s20  ;;  %s758_s5 = smov [#allocation10]  }
 0x1f3   : > { %s681_s7 = sshll.u32 %s758_s5, 4  ;;  %s682_s7 = int_to_ptr.vmem [resolvable:$false] %s681_s7 }
 0x1f4   : > { %p679_p9 = pnand %p678_p3, %p1078_p7  ;;  %s683_s11 = scalar_lea.vmem %s682_s7, 32 }
 0x1f5   : > { %p684_p5 = scmp.lt.s32.totalorder %s354_s25, %s682_s7  ;;  %p685_p11 = scmp.lt.s32.totalorder %s683_s11, %s677_s20 }
 0x1f6   : > { %p680_p12 = pneg %p679_p9 }
 0x1f7   : > { %p686_p1 = por %p685_p11, %p684_p5 }
 0x1f9   : > { %p687_p4 = pnand %p686_p1, %p680_p12 }
 0x1fb   : > { %690 = shalt.err (!%p687_p4)
}
 0x1fc   : > { %s691_s19 = scalar_lea.hbm %s1015_s9, 16  ;;  %s695_s13 = scalar_lea.hbm %s1057_s4, 48 }
 0x1fd   : > { %p692_p2 = scmp.ne.s32.totalorder %s1015_s9, %s691_s19  ;;  %p696_p10 = scmp.lt.u32.totalorder %s1015_s9, %s1057_s4 }
 0x1fe   : > { %p697_p8 = scmp.lt.u32.totalorder %s695_s13, %s691_s19  ;;  %p699_p3 = scmp.lt.u32.totalorder %s691_s19, %s1015_s9 }
 0x1ff   : > { %p693_p0 = pnand %p692_p2, %p1078_p7 }
 0x200   : > { %p698_p13 = por %p697_p8, %p696_p10 }
 0x201   : > { %p694_p6 = pneg %p693_p0 }
 0x202   : > { %p700_p9 = por %p699_p3, %p698_p13 }
 0x204   : > { %p701_p12 = pnand %p700_p9, %p694_p6 }
 0x206   : > { %704 = shalt.err (!%p701_p12)
}
 0x207   : > { %495 = dma.vmem_to_hbm [thread:$0]  (%p1078_p7), %s354_s25, 16, %s1015_s9, %s341_s27  }
 0x208 PF: > { %p520_p5 = scmp.ge.s32.totalorder %s751_s18, 2  ;;  %s365_s8 = sand.u32 1, %s739_s15  }
 0x209   : > { %p1079_p11 = scmp.ne.s32.totalorder %s1065_s22, 0  ;;  %s366_s21 = scalar_lea.sflag [#allocation4], %s365_s8 }
 0x20b   : > { %p512_p1 = pnand %p520_p5, %p1079_p11 }
 0x20d   : > { %734 = dma.done.wait (!%p512_p1), %s366_s21, 16  }
 0x20e   : > { %736 = vsyncadd (!%p512_p1), %s366_s21, 4294967280  ;;  %p21_p4 = scmp.ge.s32.totalorder %s839_s29, 5   ;;  %s1080_s15 = smov %s743_s16 }
 0x20f   : > { %s1081_s16 = smov %s747_s17  ;;  %s1082_s17 = smov %s899_s28 }
 0x210   : > { %s1083_s18 = smov %s839_s29  ;;  %23 = sbr.rel (!%p21_p4) target bundleno = 10 (0xa), region = 110 }
 0x217   :  { %370 = vsyncpa [#allocation3], 1 }
 0x218   :  { %372 = vsyncpa [#allocation3 + $0x1], 1 }
 0x219   :  { %373 = vsyncpa [#allocation6], 1 }
 0x21a   :  { %374 = vsyncpa [#allocation9], 1 }
 0x21b   :  { %376 = vsyncpa [#allocation9 + $0x1], 1 }
 0x21c   :  { %377 = vsyncpa [#allocation4], 1 }
 0x21d   :  { %379 = vsyncpa [#allocation4 + $0x1], 1 }

</bundles_post_ra>
